<compile_context>
chip_gen: v5e
topology: v5e:2x2
jax: 0.10.0
libtpu: 0.0.40
codegen_flags: <defaults>
</compile_context>

<pallas_src>
import jax
import jax.numpy as jnp
from jax.experimental import pallas as pl
from jax.experimental.pallas import tpu as pltpu

EPS = 1e-10


def _l2norm_kernel(x_ref, w_ref, o_ref):
    # x_ref: (1, C, T)  -- channels on sublanes, spatial locations on lanes
    # w_ref: (1, C, 1)
    # o_ref: (1, C, T)
    x = x_ref[...].astype(jnp.float32)
    sumsq = jnp.sum(x * x, axis=1, keepdims=True)              # (1, 1, T) XLU reduce
    inv = pl.reciprocal(jnp.sqrt(sumsq) + EPS, approx=False)   # one recip / location
    w = w_ref[...].astype(jnp.float32)                         # (1, C, 1)
    o_ref[...] = (x * (inv * w)).astype(o_ref.dtype)


def _pick_tile_hw(hw: int, c: int, dtype_bytes: int,
                  max_block_bytes: int = 2 * 1024 * 1024) -> int:
    """Largest spatial tile keeping one (1, C, tile) block under ~2 MiB.

    - If the whole H*W row fits, use a single full-extent block (always legal).
    - Otherwise the tile is a multiple of 128 (legal even when it does not
      divide H*W; Pallas pads the ragged tail block and masks its writes).
      When H*W is a multiple of 128 we prefer an exact divisor so there is no
      padded tail at all.
    """
    cap = max(128, (max_block_bytes // max(1, c * dtype_bytes)) // 128 * 128)
    if hw <= cap:
        return hw
    t = cap
    if hw % 128 == 0:
        while t > 128 and hw % t != 0:
            t -= 128
    return t


def l2norm(x_nchw: jax.Array, weight: jax.Array) -> jax.Array:
    """Channel L2 normalization matching the PyTorch L2Norm module.

    x_nchw: (N, C, H, W);  weight: (C,)
    """
    N, C, H, W = x_nchw.shape
    HW = H * W
    dtype_bytes = jnp.dtype(x_nchw.dtype).itemsize

    # Free reshapes only -- no transpose, no extra HBM traffic.
    x3d = x_nchw.reshape(N, C, HW)
    w3d = weight.reshape(1, C, 1)

    tile_hw = _pick_tile_hw(HW, C, dtype_bytes)
    grid = (N, pl.cdiv(HW, tile_hw))

    out3d = pl.pallas_call(
        _l2norm_kernel,
        out_shape=jax.ShapeDtypeStruct((N, C, HW), x_nchw.dtype),
        grid_spec=pltpu.PrefetchScalarGridSpec(
            num_scalar_prefetch=0,
            grid=grid,
            in_specs=[
                pl.BlockSpec((1, C, tile_hw), lambda n, j: (n, 0, j)),
                pl.BlockSpec((1, C, 1), lambda n, j: (0, 0, 0)),
            ],
            out_specs=pl.BlockSpec((1, C, tile_hw), lambda n, j: (n, 0, j)),
        ),
        compiler_params=pltpu.CompilerParams(
            dimension_semantics=("parallel", "parallel"),
            vmem_limit_bytes=32 * 1024 * 1024,
        ),
        cost_estimate=pl.CostEstimate(
            flops=4 * N * C * HW,
            transcendentals=2 * N * HW,
            bytes_accessed=2 * N * C * HW * dtype_bytes,
        ),
    )(x3d, w3d)

    return out3d.reshape(N, C, H, W)


def _reference(x_nchw, weight, eps=EPS):
    norm = jnp.sqrt(jnp.sum(x_nchw * x_nchw, axis=1, keepdims=True)) + eps
    return weight.reshape(1, -1, 1, 1) * (x_nchw / norm)


if __name__ == "__main__":
    key = jax.random.PRNGKey(0)
    N, C, H, W = 2, 4, 16, 16
    scale = 10.0  # L2Norm(n_channels=C, scale=10) -> weight initialized to `scale`

    x = jax.random.normal(key, (N, C, H, W), dtype=jnp.float32)
    weight = jnp.full((C,), scale, dtype=jnp.float32)  # init.constant_(weight, gamma)

    out = l2norm(x, weight)
    out = jax.block_until_ready(out)

    ref = _reference(x, weight)
    assert out.shape == (N, C, H, W)
    assert jnp.allclose(out, ref, rtol=1e-5, atol=1e-5), "mismatch vs reference"

    print("KERNEL_OK")
</pallas_src>

<mosaic_0001>
module attributes {stable_mosaic.version = 11 : i64} {
  func.func @_l2norm_kernel(%arg0: i32, %arg1: i32, %arg2: memref<1x4x256xf32, #tpu.memory_space<vmem>>, %arg3: memref<1x4x1xf32, #tpu.memory_space<vmem>>, %arg4: memref<1x4x256xf32, #tpu.memory_space<vmem>>) attributes {dimension_semantics = [#tpu.dimension_semantics<parallel>, #tpu.dimension_semantics<parallel>], iteration_bounds = array<i64: 2, 1>, scalar_prefetch = 0 : i64, scratch_operands = 0 : i64, tpu.core_type = #tpu.core_type<tc>, window_params = [{transform_indices = @transform_0, window_bounds = array<i64: 1, 4, 256>}, {pipeline_mode = #tpu.pipeline_mode<synchronous>, transform_indices = @transform_1, window_bounds = array<i64: 1, 4, 1>}, {transform_indices = @transform_2, window_bounds = array<i64: 1, 4, 256>}]} {
    %c0 = arith.constant 0 : index
    %c0_0 = arith.constant 0 : index
    %c0_1 = arith.constant 0 : index
    %0 = vector.load %arg2[%c0, %c0_0, %c0_1] : memref<1x4x256xf32, #tpu.memory_space<vmem>>, vector<1x4x256xf32>
    %1 = arith.mulf %0, %0 : vector<1x4x256xf32>
    %cst = arith.constant dense<0.000000e+00> : vector<1x256xf32>
    %2 = vector.multi_reduction <add>, %1, %cst [1] : vector<1x4x256xf32> to vector<1x256xf32>
    %3 = vector.shape_cast %2 : vector<1x256xf32> to vector<1x1x256xf32>
    %4 = math.sqrt %3 : vector<1x1x256xf32>
    %cst_2 = arith.constant 1.000000e-10 : f32
    %5 = vector.broadcast %cst_2 : f32 to vector<1x1x256xf32>
    %6 = arith.addf %4, %5 : vector<1x1x256xf32>
    %7 = tpu.reciprocal %6 : vector<1x1x256xf32> -> vector<1x1x256xf32>
    %c0_3 = arith.constant 0 : index
    %c0_4 = arith.constant 0 : index
    %c0_5 = arith.constant 0 : index
    %8 = vector.load %arg3[%c0_3, %c0_4, %c0_5] : memref<1x4x1xf32, #tpu.memory_space<vmem>>, vector<1x4x1xf32>
    %9 = vector.broadcast %7 : vector<1x1x256xf32> to vector<1x4x256xf32>
    %10 = vector.broadcast %8 : vector<1x4x1xf32> to vector<1x4x256xf32>
    %11 = arith.mulf %9, %10 : vector<1x4x256xf32>
    %12 = arith.mulf %0, %11 : vector<1x4x256xf32>
    %c0_6 = arith.constant 0 : index
    %c0_7 = arith.constant 0 : index
    %c0_8 = arith.constant 0 : index
    %13 = vector.load %arg4[%c0_6, %c0_7, %c0_8] : memref<1x4x256xf32, #tpu.memory_space<vmem>>, vector<1x4x256xf32>
    tpu.vector_store %arg4[%c0_6, %c0_7, %c0_8], %12 {strides = array<i32>} : memref<1x4x256xf32, #tpu.memory_space<vmem>>, vector<1x4x256xf32>,
    return
  }
  func.func @transform_0(%arg0: i32, %arg1: i32) -> (i32, i32, i32) {
    %c0_i32 = arith.constant 0 : i32
    %c0_i32_0 = arith.constant 0 : i32
    return %arg0, %c0_i32, %arg1 : i32, i32, i32
  }
  func.func @transform_1(%arg0: i32, %arg1: i32) -> (i32, i32, i32) {
    %c0_i32 = arith.constant 0 : i32
    %c0_i32_0 = arith.constant 0 : i32
    %c0_i32_1 = arith.constant 0 : i32
    %c0_i32_2 = arith.constant 0 : i32
    return %c0_i32, %c0_i32_0, %c0_i32_1 : i32, i32, i32
  }
  func.func @transform_2(%arg0: i32, %arg1: i32) -> (i32, i32, i32) {
    %c0_i32 = arith.constant 0 : i32
    %c0_i32_0 = arith.constant 0 : i32
    return %arg0, %c0_i32, %arg1 : i32, i32, i32
  }
}

</mosaic_0001>

<bundles_post_ra>
// kernel: tpu_custom_call.1
= control target key start
LH: loop header
LB: loop body
LE: loop exit
PB: predicated region body
PF: predicated region fallthrough
CT: control target
= control target key end

     0   :  { %7 = vsyncpa [#allocation3], 0  ;;  %s731_s0 = inlined_call_operand.hbm [shape: f32[2,4,256], index: 0, kind: input, shape index: {}]   ;;  %s732_s1 = inlined_call_operand.vmem [shape: f32[1,4,1], index: 1, kind: input, shape index: {}]   ;;  %s733_s2 = inlined_call_operand.hbm [shape: f32[2,4,256], index: 2, kind: output, shape index: {}]  }
   0x1   :  { %9 = vsyncpa [#allocation3 + $0x1], 0 }
   0x2   :  { %10 = vsyncpa [#allocation4], 0 }
   0x3   :  { %12 = vsyncpa [#allocation4 + $0x1], 0  ;;  %s596_s9 = smov 0   ;;  %s598_s10 = smov 0  }
   0x4   :  { %s600_s11 = smov 0   ;;  %s602_s12 = smov 0  }
   0x5   :  { %s604_s13 = smov 0   ;;  %s606_s14 = smov 0  }
   0x6 LB: > { %s377_s15 = sadd.s32 4294967295, %s578_s14   ;;  %s378_s16 = sadd.s32 4294967294, %s578_s14   ;;  %s578_s14 = sphi %s606_s14, %s18_s14   ;;  %s574_s13 = sphi %s604_s13, %s742_s13   ;;  %s570_s12 = sphi %s602_s12, %s741_s12   ;;  %s566_s11 = sphi %s600_s11, %s740_s11   ;;  %s562_s10 = sphi %s598_s10, %s739_s10   ;;  %s558_s9 = sphi %s596_s9, %s738_s9  }
   0x7   : > { %s30_s17 = sadd.s32 1, %s574_s13  ;;  %s39_s18 = sadd.s32 1, %s566_s11 }
   0x8   : > { %p32_p0 = scmp.ge.s32.totalorder %s30_s17, 2  ;;  %p46_p1 = scmp.ne.s32.totalorder %s566_s11, %s562_s10 }
   0x9   : > { %p47_p2 = scmp.eq.s32.totalorder %s578_s14, 0  ;;  %p52_p3 = scmp.ne.s32.totalorder %s562_s10, %s558_s9 }
   0xa   : > { %s744_s17 = smov (%p32_p0, %s30_s17), 0  ;;  %p53_p5 = scmp.eq.s32.totalorder %s377_s15, 0 }
   0xb   : > { %p637_p4 = por %p47_p2, %p46_p1  ;;  %s34_s20 = ssub.s32 %s574_s13, %s744_s17 }
   0xc   : > { %p99_p6 = scmp.eq.s32.totalorder %s377_s15, 1  ;;  %p37_p7 = scmp.eq.s32.totalorder %s34_s20, 0 }
   0xd   : > { %p643_p8 = por %p53_p5, %p52_p3  ;;  %p105_p10 = scmp.eq.s32.totalorder %s378_s16, 1 }
   0xe   : > { %p647_p9 = por %p99_p6, %p46_p1  ;;  %p380_p12 = scmp.ge.s32.totalorder %s578_s14, 2 }
   0xf   : > { %s652_s23 = scalar_select %p37_p7, %s566_s11, %s39_s18  }
  0x10   : > { %p654_p11 = por %p105_p10, %p52_p3  ;;  %p406_p13 = scmp.lt.s32.totalorder %s578_s14, 2 }
  0x11   : > { %s128_s25 = sand.u32 1, %s566_s11   ;;  %s392_s27 = sshll.u32 %s574_s13, 3 }
  0x12   : > { %s381_s26 = sshll.u32 %s128_s25, 3  ;;  %s139_s30 = scalar_lea.hbm %s731_s0, %s392_s27 }
  0x13   : > { %s132_s3 = scalar_lea.vmem [#allocation2], %s381_s26  ;;  %s141_s5 = sshll.u32 %s139_s30, 4  ;;  %s142_s5 = int_to_ptr.hbm [resolvable:$true] %s141_s5 }
  0x14   : > { %s143_s4 = sshll.u32 %s132_s3, 4  ;;  %p399_p0 = pnand %p406_p13, %p637_p4  ;;  %s144_s4 = int_to_ptr.vmem [resolvable:$true] %s143_s4 }
  0x15   : > { %p384_p1 = scmp.ge.s32.totalorder %s578_s14, 1  ;;  %p148_p2 = scmp.lt.s32.totalorder %s578_s14, 3 }
  0x16   : > { %s129_s6 = scalar_lea.sflag [#allocation3], %s128_s25 }
  0x17   : > { %401 = dma.hbm_to_vmem [thread:$0]  (!%p399_p0), %s142_s5, 128, %s144_s4, %s129_s6  }
  0x18   : > { %p149_p3 = pnand %p384_p1, %p148_p2 }
  0x19   : > { %s670_s7 = sand.u32 (!%p149_p3), 1, %s562_s10  }
  0x1a   : > { %152 = sbr.rel (%p149_p3) target bundleno = 159 (0x9f), region = 28  ;;  %s385_s8 = sshll.u32 (!%p149_p3), %s670_s7, 3 }
  0x1b   : > { %s155_s15 = scalar_lea.sflag (!%p149_p3), [#allocation3], %s670_s7  ;;  %s158_s16 = scalar_lea.vmem (!%p149_p3), [#allocation2], %s385_s8 }
  0x1f   : > { %549 = dma.done.wait (%p643_p8), %s155_s15, 128  }
  0x20   : > { %551 = vsyncadd (%p643_p8), %s155_s15, 4294967168  ;;  %v580_v0 = vmov 0   ;;  %v259_v1 = vld [vmem:[%s732_s1] sm:$0xf]  ;;  %v683_v2 = vld [vmem:[%s158_s16] sm:$0xff]  ;;  %vm190_vm0 = vcmask 1043456  }
  0x21   : > { %457 = vset.pattern.permute.xlu0 %v580_v0  ;;  %v183_v3 = vmul.f32 %v683_v2, %v683_v2  ;;  %s393_s20 = sshll.u32 %s570_s12, 3  ;;  %s179_s27 = scalar_lea.vmem [#allocation5], %s385_s8 }
  0x22   : > { %262 = vperm.xlu0 %457, %v259_v1   ;;  %s288_s26 = scalar_lea.hbm %s733_s2, %s393_s20  ;;  %s290_s28 = sshll.u32 %s179_s27, 4  ;;  %s291_s28 = int_to_ptr.vmem [resolvable:$true] %s290_s28 }
  0x23   : > { %185 = vst [vmem:[#allocation1] ss:$2 sm:$0xff] %v183_v3  ;;  %s292_s29 = sshll.u32 %s288_s26, 4  ;;  %s275_s12 = scalar_lea.sflag [#allocation4], %s670_s7  ;;  %s293_s29 = int_to_ptr.hbm [resolvable:$true] %s292_s29 }
  0x24   : > { %s510_s30 = sshra.s32 %s293_s29, 4  ;;  %s516_s6 = scalar_lea.hbm %s733_s2, 16  ;;  %s511_s30 = int_to_ptr.hbm [resolvable:$true] %s510_s30 }
  0x25   : > { %s512_s3 = scalar_lea.hbm %s511_s30, 8  ;;  %p517_p7 = scmp.lt.s32.totalorder %s511_s30, %s733_s2 }
  0x26   : > { %p513_p4 = scmp.ne.s32.totalorder %s511_s30, %s512_s3  ;;  %p518_p8 = scmp.lt.s32.totalorder %s516_s6, %s512_s3 }
  0x28   : > { %p514_p5 = pnand %p513_p4, %p647_p9  ;;  %p519_p10 = por %p518_p8, %p517_p7 }
  0x2a   : > { %v186_v4 = vld.sshfl [vmem:[#allocation1] sm:$0xff pattern:$0x75316420]  ;;  %v187_v5 = vld.sshfl [vmem:[#allocation1 + $0x8] sm:$0xff pattern:$0x75316420]  ;;  %p515_p6 = pneg %p514_p5 }
  0x2b   : > { %v191_v6 = vsel %vm190_vm0, %v186_v4, 0.0  ;;  %v198_v7 = vsel %vm190_vm0, %v187_v5, 0.0 }
  0x2c   : > { %v192_v8 = vrot.slane %v191_v6, 4  ;;  %v199_v9 = vrot.slane %v198_v7, 4  ;;  %p520_p13 = pnand %p519_p10, %p515_p6 }
  0x2e   : > { %v193_v10 = vadd.f32 %v192_v8, %v191_v6  ;;  %v200_v11 = vadd.f32 %v199_v9, %v198_v7 }
  0x30   : > { %v194_v12 = vrot.slane %v193_v10, 2  ;;  %v201_v13 = vrot.slane %v200_v11, 2 }
  0x32   : > { %v195_v14 = vadd.f32 %v194_v12, %v193_v10  ;;  %v202_v15 = vadd.f32 %v201_v13, %v200_v11 }
  0x34   : > { %v196_v16 = vrot.slane %v195_v14, 1  ;;  %v203_v17 = vrot.slane %v202_v15, 1 }
  0x36   : > { %v197_v18 = vadd.f32 %v196_v16, %v195_v14  ;;  %v204_v19 = vadd.f32 %v203_v17, %v202_v15 }
  0x38   : > { %458 = vrsqrt.f32 %v197_v18  ;;  %vm224_vm1 = vcmp.eq.f32.partialorder %v204_v19, inf  ;;  %vm212_vm2 = vcmp.eq.f32.partialorder %v197_v18, inf  ;;  %v227_v34 = vand.u32 2147483648, %v204_v19 }
  0x39   : > { %460 = vrsqrt.f32 %v204_v19  ;;  %vm226_vm3 = vcmp.eq.f32.partialorder %v204_v19, 0.0  ;;  %v215_v36 = vand.u32 2147483648, %v197_v18  ;;  %vm214_vm4 = vcmp.eq.f32.partialorder %v197_v18, 0.0 }
  0x3e   : > { %v459_v20 = vpop.eup %458 }
  0x3f   : > { %v461_v21 = vpop.eup %460  ;;  %v206_v23 = vmul.f32 %v459_v20, %v197_v18 }
  0x40   : > { %v218_v22 = vmul.f32 %v461_v21, %v204_v19 }
  0x41   : > { %v207_v25 = vmul.f32 %v459_v20, %v206_v23 }
  0x42   : > { %v219_v24 = vmul.f32 %v461_v21, %v218_v22 }
  0x43   : > { %v208_v27 = vmul.f32 0.5, %v207_v25 }
  0x44   : > { %v220_v26 = vmul.f32 0.5, %v219_v24 }
  0x45   : > { %v209_v29 = vsub.f32 1.5, %v208_v27 }
  0x46   : > { %v221_v28 = vsub.f32 1.5, %v220_v26 }
  0x47   : > { %v210_v31 = vmul.f32 %v459_v20, %v209_v29 }
  0x48   : > { %v222_v30 = vmul.f32 %v461_v21, %v221_v28 }
  0x49   : > { %v211_v33 = vmul.f32 %v210_v31, %v197_v18 }
  0x4a   : > { %v223_v32 = vmul.f32 %v222_v30, %v204_v19 }
  0x4b   : > { %v213_v37 = vsel %vm212_vm2, %v197_v18, %v211_v33 }
  0x4c   : > { %v225_v35 = vsel %vm224_vm1, %v204_v19, %v223_v32  ;;  %v216_v39 = vsel %vm214_vm4, %v215_v36, %v213_v37 }
  0x4d   : > { %v228_v38 = vsel %vm226_vm3, %v227_v34, %v225_v35  ;;  %v229_v41 = vadd.f32 1e-10, %v216_v39 }
  0x4e   : > { %v230_v40 = vadd.f32 1e-10, %v228_v38 }
  0x4f   : > { %vm236_vm7 = vweird.f32 %v229_v41  ;;  %v242_v53 = vand.u32 2147483648, %v229_v41  ;;  %v240_v55 = vand.u32 2147483647, %v229_v41 }
  0x50   : > { %462 = vrcp.f32 %v230_v40  ;;  %vm250_vm5 = vweird.f32 %v230_v40  ;;  %v256_v50 = vand.u32 2147483648, %v230_v40  ;;  %v254_v52 = vand.u32 2147483647, %v230_v40 }
  0x51   : > { %464 = vrcp.f32 %v229_v41  ;;  %v243_v58 = vor.u32 1.1754944e-38, %v242_v53  ;;  %vm241_vm12 = vcmp.eq.f32.partialorder %v240_v55, 8.507059e+37 }
  0x52   : > { %v257_v56 = vor.u32 1.1754944e-38, %v256_v50  ;;  %vm255_vm11 = vcmp.eq.f32.partialorder %v254_v52, 8.507059e+37 }
  0x56   : > { %v463_v42 = vpop.eup %462 }
  0x57   : > { %v465_v43 = vpop.eup %464  ;;  %v246_v44 = vmul.f32 %v463_v42, %v230_v40  ;;  %vm251_vm6 = vweird.f32 %v463_v42 }
  0x58   : > { %v232_v45 = vmul.f32 %v465_v43, %v229_v41  ;;  %vm237_vm8 = vweird.f32 %v465_v43  ;;  %vm252_vm9 = vmor %vm250_vm5, %vm251_vm6 }
  0x59   : > { %v247_v46 = vsub.f32 1.0, %v246_v44  ;;  %vm238_vm10 = vmor %vm236_vm7, %vm237_vm8 }
  0x5a   : > { %v233_v47 = vsub.f32 1.0, %v232_v45 }
  0x5b   : > { %v248_v48 = vmul.f32 %v463_v42, %v247_v46 }
  0x5c   : > { %v234_v49 = vmul.f32 %v465_v43, %v233_v47 }
  0x5d   : > { %v249_v51 = vadd.f32 %v463_v42, %v248_v48 }
  0x5e   : > { %v235_v54 = vadd.f32 %v465_v43, %v234_v49 }
  0x5f   : > { %v253_v57 = vsel %vm252_vm9, %v463_v42, %v249_v51 }
  0x60   : > { %v239_v59 = vsel %vm238_vm10, %v465_v43, %v235_v54  ;;  %v258_v60 = vsel %vm255_vm11, %v257_v56, %v253_v57 }
  0x61   : > { %v244_v62 = vsel %vm241_vm12, %v243_v58, %v239_v59 }
  0x94   : > { %v263_v61 = vpop.permute.xlu0 %262 }
  0x95   : > { %v266_v63 = vmul.f32 %v263_v61, %v258_v60  ;;  %v265_v0 = vmul.f32 %v263_v61, %v244_v62 }
  0x97   : > { %v269_v1 = vrot.slane %v266_v63, 4 }
  0x99   : > { %v270_v3 = vsel %vm190_vm0, %v265_v0, %v269_v1 }
  0x9a   : > { %v272_v4 = vmul.f32 %v270_v3, %v683_v2 }
  0x9c   : > { %273 = vst [vmem:[%s179_s27] sm:$0xff] %v272_v4 }
  0x9d   : > { %523 = shalt.err (!%p520_p13)
}
  0x9e   : > { %396 = dma.vmem_to_hbm [thread:$0]  (%p647_p9), %s291_s28, 128, %s293_s29, %s275_s12  }
  0x9f PF: > { %s304_s7 = sand.u32 1, %s558_s9   ;;  %p403_p0 = pnand %p380_p12, %p654_p11 }
  0xa0   : > { %s305_s16 = scalar_lea.sflag [#allocation4], %s304_s7 }
  0xa1   : > { %p404_p1 = pneg %p403_p0 }
  0xa3   : > { %553 = dma.done.wait (%p404_p1), %s305_s16, 128  }
  0xa4   : > { %555 = vsyncadd (%p404_p1), %s305_s16, 4294967168  ;;  %s18_s14 = sadd.s32 1, %s578_s14   ;;  %s738_s9 = smov %s562_s10 }
  0xa5   : > { %p15_p2 = scmp.ge.s32.totalorder %s18_s14, 4   ;;  %s739_s10 = smov %s566_s11 }
  0xa6   : > { %s740_s11 = smov %s652_s23  ;;  %s741_s12 = smov %s574_s13 }
  0xa7   : > { %s742_s13 = smov %s744_s17  ;;  %17 = sbr.rel (!%p15_p2) target bundleno = 6 (0x6), region = 73 }
  0xac   :  { %311 = vsyncpa [#allocation3], 1 }
  0xad   :  { %313 = vsyncpa [#allocation3 + $0x1], 1 }
  0xae   :  { %314 = vsyncpa [#allocation4], 1 }
  0xaf   :  { %316 = vsyncpa [#allocation4 + $0x1], 1 }

</bundles_post_ra>
